<compile_context>
chip_gen: v7x
topology: tpu7x:2x2x1
jax: 0.10.0
libtpu: 0.0.40
codegen_flags: <defaults>
</compile_context>

<pallas_src>
import jax
import jax.numpy as jnp
from jax.experimental import pallas as pl
from jax.experimental.pallas import tpu as pltpu


def _bilinear_matrix(out_size: int, in_size: int) -> jnp.ndarray:
    """Dense (out_size, in_size) interpolation matrix matching
    torch.nn.functional.interpolate(mode='bilinear', align_corners=False)
    along one axis (no antialias). Rows sum to 1."""
    scale = in_size / out_size
    dst = jnp.arange(out_size, dtype=jnp.float32)
    src = (dst + 0.5) * scale - 0.5
    src = jnp.clip(src, 0.0, float(in_size - 1))
    lo = jnp.floor(src).astype(jnp.int32)
    hi = jnp.minimum(lo + 1, in_size - 1)
    frac = src - lo.astype(jnp.float32)
    rows = jnp.arange(out_size)
    w = jnp.zeros((out_size, in_size), jnp.float32)
    w = w.at[rows, lo].add(1.0 - frac)
    w = w.at[rows, hi].add(frac)
    return w


def _resize_normalize_kernel(x_ref, mcol_ref, scol_ref, wwT_ref, wh_ref, o_ref):
    Bblk, C, H_in, W_in = x_ref.shape
    H_out = wh_ref.shape[0]
    W_out = wwT_ref.shape[1]
    BC = Bblk * C

    # Normalize on the input (exact: interpolation rows sum to 1) with a
    # precomputed per-row (mean, 1/std) column: shift + single multiply.
    x2 = x_ref[...].reshape(BC * H_in, W_in)            # leading-dim collapse only
    x2 = (x2 - mcol_ref[...]) * scol_ref[...]

    # Width pass: one tall matmul fills MXU rows instead of N*C slivers.
    t = jnp.dot(x2, wwT_ref[...], preferred_element_type=jnp.float32)

    # Height pass: batched matmul over every (image, channel) plane at once.
    t3 = t.reshape(BC, H_in, W_out)
    wh_b = jnp.broadcast_to(wh_ref[...], (BC, H_out, H_in))   # hoisted once/step
    out = jnp.einsum("boh,bhw->bow", wh_b, t3,
                     preferred_element_type=jnp.float32)       # (BC, H_out, W_out)

    o_ref[...] = out.reshape(Bblk, C, H_out, W_out).astype(o_ref.dtype)


def _pick_batch_block(N, C, H_in, W_in, H_out, W_out,
                      budget_bytes=8 * 1024 * 1024):
    """Largest batch chunk whose f32 in/intermediate/out footprint fits a
    conservative VMEM budget (sized with headroom for v7x's 64 MiB VMEM and
    double buffering), while keeping >=2 grid steps when possible."""
    per_image = 4 * C * (H_in * W_in + H_in * W_out + H_out * W_out)
    b = max(1, budget_bytes // (3 * per_image))
    b = min(b, N)
    if b == N and N > 1:
        b = (N + 1) // 2          # keep the grid >= 2 steps (2 TCs on v7x)
    while N % b:                  # avoid ragged last block
        b -= 1
    return b


def preprocessing_model(x, resize, mean, std):
    """x: (N, C, H, W) float32. resize: int (square input assumed, so output
    spatial = (resize, resize)). mean/std: length-C sequences."""
    N, C, H_in, W_in = x.shape
    assert H_in == W_in, "square input assumed for Resize(int) semantics"
    H_out = W_out = int(resize)

    wh = _bilinear_matrix(H_out, H_in)            # (H_out, H_in)
    wwT = _bilinear_matrix(W_out, W_in).T         # (W_in, W_out)

    mean = jnp.asarray(mean, jnp.float32)
    inv_std = 1.0 / jnp.asarray(std, jnp.float32)

    Bblk = _pick_batch_block(N, C, H_in, W_in, H_out, W_out)
    grid = (N // Bblk,)

    # Per-row shift / scale columns for the flattened (Bblk*C*H_in, W_in) block.
    mcol = jnp.tile(jnp.repeat(mean, H_in), Bblk)[:, None]      # (Bblk*C*H_in, 1)
    scol = jnp.tile(jnp.repeat(inv_std, H_in), Bblk)[:, None]   # (Bblk*C*H_in, 1)

    return pl.pallas_call(
        _resize_normalize_kernel,
        out_shape=jax.ShapeDtypeStruct((N, C, H_out, W_out), x.dtype),
        grid=grid,
        in_specs=[
            pl.BlockSpec((Bblk, C, H_in, W_in), lambda i: (i, 0, 0, 0)),
            pl.BlockSpec((Bblk * C * H_in, 1), lambda i: (0, 0)),
            pl.BlockSpec((Bblk * C * H_in, 1), lambda i: (0, 0)),
            pl.BlockSpec((W_in, W_out), lambda i: (0, 0)),
            pl.BlockSpec((H_out, H_in), lambda i: (0, 0)),
        ],
        out_specs=pl.BlockSpec((Bblk, C, H_out, W_out), lambda i: (i, 0, 0, 0)),
        compiler_params=pltpu.CompilerParams(
            dimension_semantics=("parallel",),
            vmem_limit_bytes=48 * 1024 * 1024,
        ),
    )(x, mcol, scol, wwT, wh)


def _reference(x, resize, mean, std):
    """Pure-JAX reference with the module's semantics: resize, then normalize."""
    N, C, H_in, W_in = x.shape
    wh = _bilinear_matrix(resize, H_in)
    ww = _bilinear_matrix(resize, W_in)
    y = jnp.einsum("oh,nchw->ncow", wh, x)
    y = jnp.einsum("pw,ncow->ncop", ww, y)
    mean = jnp.asarray(mean, jnp.float32).reshape(1, C, 1, 1)
    std = jnp.asarray(std, jnp.float32).reshape(1, C, 1, 1)
    return (y - mean) / std


if __name__ == "__main__":
    key = jax.random.PRNGKey(0)
    N, C, H, W = 2, 3, 16, 16
    RESIZE = 24
    MEAN = [0.485, 0.456, 0.406]
    STD = [0.229, 0.224, 0.225]

    x = jax.random.uniform(key, (N, C, H, W), dtype=jnp.float32)

    out = preprocessing_model(x, RESIZE, MEAN, STD)
    out = jax.block_until_ready(out)

    ref = _reference(x, RESIZE, MEAN, STD)
    assert out.shape == (N, C, RESIZE, RESIZE)
    assert jnp.allclose(out, ref, atol=1e-4, rtol=1e-4), "mismatch vs reference"

    # TODO(synk): torchvision Resize applies antialiasing when *down*scaling and
    # handles non-square Resize(int) by shorter edge; this kernel matches the
    # non-antialiased bilinear path on square inputs (exact for upscaling).
    print("KERNEL_OK")
</pallas_src>

<mosaic_0001>
module attributes {stable_mosaic.version = 11 : i64} {
  func.func @_resize_normalize_kernel(%arg0: i32, %arg1: memref<1x3x16x16xf32, #tpu.memory_space<vmem>>, %arg2: memref<48x1xf32, #tpu.memory_space<vmem>>, %arg3: memref<48x1xf32, #tpu.memory_space<vmem>>, %arg4: memref<16x24xf32, #tpu.memory_space<vmem>>, %arg5: memref<24x16xf32, #tpu.memory_space<vmem>>, %arg6: memref<1x3x24x24xf32, #tpu.memory_space<vmem>>) attributes {dimension_semantics = [#tpu.dimension_semantics<parallel>], iteration_bounds = array<i64: 2>, scalar_prefetch = 0 : i64, scratch_operands = 0 : i64, tpu.core_type = #tpu.core_type<tc>, window_params = [{transform_indices = @transform_0, window_bounds = array<i64: 1, 3, 16, 16>}, {pipeline_mode = #tpu.pipeline_mode<synchronous>, transform_indices = @transform_1, window_bounds = array<i64: 48, 1>}, {pipeline_mode = #tpu.pipeline_mode<synchronous>, transform_indices = @transform_2, window_bounds = array<i64: 48, 1>}, {pipeline_mode = #tpu.pipeline_mode<synchronous>, transform_indices = @transform_3, window_bounds = array<i64: 16, 24>}, {pipeline_mode = #tpu.pipeline_mode<synchronous>, transform_indices = @transform_4, window_bounds = array<i64: 24, 16>}, {transform_indices = @transform_5, window_bounds = array<i64: 1, 3, 24, 24>}]} {
    %c0 = arith.constant 0 : index
    %c0_0 = arith.constant 0 : index
    %c0_1 = arith.constant 0 : index
    %c0_2 = arith.constant 0 : index
    %0 = vector.load %arg1[%c0, %c0_0, %c0_1, %c0_2] : memref<1x3x16x16xf32, #tpu.memory_space<vmem>>, vector<1x3x16x16xf32>
    %1 = vector.shape_cast %0 : vector<1x3x16x16xf32> to vector<48x16xf32>
    %c0_3 = arith.constant 0 : index
    %c0_4 = arith.constant 0 : index
    %2 = vector.load %arg2[%c0_3, %c0_4] : memref<48x1xf32, #tpu.memory_space<vmem>>, vector<48x1xf32>
    %3 = vector.broadcast %2 : vector<48x1xf32> to vector<48x16xf32>
    %4 = arith.subf %1, %3 : vector<48x16xf32>
    %c0_5 = arith.constant 0 : index
    %c0_6 = arith.constant 0 : index
    %5 = vector.load %arg3[%c0_5, %c0_6] : memref<48x1xf32, #tpu.memory_space<vmem>>, vector<48x1xf32>
    %6 = vector.broadcast %5 : vector<48x1xf32> to vector<48x16xf32>
    %7 = arith.mulf %4, %6 : vector<48x16xf32>
    %c0_7 = arith.constant 0 : index
    %c0_8 = arith.constant 0 : index
    %8 = vector.load %arg4[%c0_7, %c0_8] : memref<16x24xf32, #tpu.memory_space<vmem>>, vector<16x24xf32>
    %cst = arith.constant dense<0.000000e+00> : vector<48x24xf32>
    %9 = tpu.matmul %7, %8, %cst {dimension_numbers = #tpu.dot_dimension_numbers<[1], [0], [0], [1], [0, 0, 1, 1], [], []>} : vector<48x16xf32>, vector<16x24xf32>, vector<48x24xf32> -> vector<48x24xf32>
    %10 = vector.shape_cast %9 : vector<48x24xf32> to vector<3x16x24xf32>
    %c0_9 = arith.constant 0 : index
    %c0_10 = arith.constant 0 : index
    %11 = vector.load %arg5[%c0_9, %c0_10] : memref<24x16xf32, #tpu.memory_space<vmem>>, vector<24x16xf32>
    %12 = vector.shape_cast %11 : vector<24x16xf32> to vector<1x24x16xf32>
    %13 = vector.broadcast %12 : vector<1x24x16xf32> to vector<3x24x16xf32>
    "tpu.trace_start"() <{level = 10 : i32, message = "boh,bhw->bow"}> : () -> ()
    %cst_11 = arith.constant dense<0.000000e+00> : vector<3x24x24xf32>
    %14 = tpu.matmul %13, %10, %cst_11 {dimension_numbers = #tpu.dot_dimension_numbers<[2], [1], [1], [2], [0, 0, 0, 1, 1, 2], [0], [0]>} : vector<3x24x16xf32>, vector<3x16x24xf32>, vector<3x24x24xf32> -> vector<3x24x24xf32>
    "tpu.trace_stop"() : () -> ()
    %15 = vector.shape_cast %14 : vector<3x24x24xf32> to vector<1x3x24x24xf32>
    %c0_12 = arith.constant 0 : index
    %c0_13 = arith.constant 0 : index
    %c0_14 = arith.constant 0 : index
    %c0_15 = arith.constant 0 : index
    %16 = vector.load %arg6[%c0_12, %c0_13, %c0_14, %c0_15] : memref<1x3x24x24xf32, #tpu.memory_space<vmem>>, vector<1x3x24x24xf32>
    tpu.vector_store %arg6[%c0_12, %c0_13, %c0_14, %c0_15], %15 {strides = array<i32>} : memref<1x3x24x24xf32, #tpu.memory_space<vmem>>, vector<1x3x24x24xf32>,
    return
  }
  func.func @transform_0(%arg0: i32) -> (i32, i32, i32, i32) {
    %c0_i32 = arith.constant 0 : i32
    %c0_i32_0 = arith.constant 0 : i32
    %c0_i32_1 = arith.constant 0 : i32
    %c0_i32_2 = arith.constant 0 : i32
    return %arg0, %c0_i32, %c0_i32_0, %c0_i32_1 : i32, i32, i32, i32
  }
  func.func @transform_1(%arg0: i32) -> (i32, i32) {
    %c0_i32 = arith.constant 0 : i32
    %c0_i32_0 = arith.constant 0 : i32
    %c0_i32_1 = arith.constant 0 : i32
    return %c0_i32, %c0_i32_0 : i32, i32
  }
  func.func @transform_2(%arg0: i32) -> (i32, i32) {
    %c0_i32 = arith.constant 0 : i32
    %c0_i32_0 = arith.constant 0 : i32
    %c0_i32_1 = arith.constant 0 : i32
    return %c0_i32, %c0_i32_0 : i32, i32
  }
  func.func @transform_3(%arg0: i32) -> (i32, i32) {
    %c0_i32 = arith.constant 0 : i32
    %c0_i32_0 = arith.constant 0 : i32
    %c0_i32_1 = arith.constant 0 : i32
    return %c0_i32, %c0_i32_0 : i32, i32
  }
  func.func @transform_4(%arg0: i32) -> (i32, i32) {
    %c0_i32 = arith.constant 0 : i32
    %c0_i32_0 = arith.constant 0 : i32
    %c0_i32_1 = arith.constant 0 : i32
    return %c0_i32, %c0_i32_0 : i32, i32
  }
  func.func @transform_5(%arg0: i32) -> (i32, i32, i32, i32) {
    %c0_i32 = arith.constant 0 : i32
    %c0_i32_0 = arith.constant 0 : i32
    %c0_i32_1 = arith.constant 0 : i32
    %c0_i32_2 = arith.constant 0 : i32
    return %arg0, %c0_i32, %c0_i32_0, %c0_i32_1 : i32, i32, i32, i32
  }
}

</mosaic_0001>

<bundles_post_ra>
// kernel: tpu_custom_call.1
= control target key start
LH: loop header
LB: loop body
LE: loop exit
PB: predicated region body
PF: predicated region fallthrough
CT: control target
= control target key end

     0   :  { %10 = vsyncpa [#allocation3], 0  ;;  %s1220_s0 = inlined_call_operand.vmem [shape: f32[2,3,16,16], index: 0, kind: input, shape index: {}]   ;;  %s1221_s1 = inlined_call_operand.vmem [shape: f32[48,1], index: 1, kind: input, shape index: {}]   ;;  %s1222_s2 = inlined_call_operand.vmem [shape: f32[48,1], index: 2, kind: input, shape index: {}]   ;;  %s1223_s3 = inlined_call_operand.vmem [shape: f32[16,24], index: 3, kind: input, shape index: {}]   ;;  %s1224_s4 = inlined_call_operand.vmem [shape: f32[24,16], index: 4, kind: input, shape index: {}]   ;;  %s1225_s5 = inlined_call_operand.hbm [shape: f32[2,3,24,24], index: 5, kind: output, shape index: {}]  }
   0x1   :  { %12 = vsyncpa [#allocation3 + $0x1], 0  ;;  %s1029_s18 = smov 0   ;;  %s1031_s19 = smov 0  }
   0x2   :  { %s1033_s20 = smov 0   ;;  %s1035_s21 = smov 0  }
   0x3 LB: > { %s1050_s22 = sadd.s32 4294967295, %s990_s21   ;;  %s767_s23 = sadd.s32 4294967294, %s990_s21   ;;  %s990_s21 = sphi %s1035_s21, %s1231_s21   ;;  %s986_s20 = sphi %s1033_s20, %s1230_s20   ;;  %s982_s19 = sphi %s1031_s19, %s1229_s19   ;;  %s978_s18 = sphi %s1029_s18, %s1228_s18  }
   0x4   : > { %s1054_s24 = sadd.s32 1, %s990_s21   ;;  %s135_s25 = sadd.s32 1, %s986_s20 }
   0x5   : > { %s132_s26 = ssub.s32 %s990_s21, %s1054_s24  ;;  %p145_p0 = scmp.ne.s32.totalorder %s986_s20, %s982_s19 }
   0x6   : > { %p133_p1 = scmp.eq.s32.totalorder %s132_s26, 0  ;;  %p146_p2 = scmp.eq.s32.totalorder %s1050_s22, 1 }
   0x7   : > { %p151_p3 = scmp.ne.s32.totalorder %s982_s19, %s978_s18  ;;  %p152_p4 = scmp.eq.s32.totalorder %s767_s23, 1 }
   0x8   : > { %s1065_s27 = scalar_select %p133_p1, %s986_s20, %s135_s25  }
   0x9   : > { %p1067_p5 = por %p146_p2, %p145_p0  ;;  %p1071_p6 = por %p152_p4, %p151_p3 }
   0xa   : > { %p770_p7 = scmp.ge.s32.totalorder %s990_s21, 1  ;;  %p190_p8 = scmp.lt.s32.totalorder %s990_s21, 3 }
   0xc   : > { %p191_p9 = pnand %p770_p7, %p190_p8 }
   0xd   : > { %v271_v0 = vld [vmem:[%s1222_s2] sm:$0xff] (!%p191_p9)  ;;  %v992_v2 = vmov (!%p191_p9), 0   ;;  %v272_v3 = vld [vmem:[%s1222_s2 + $0x8] sm:$0xff] (!%p191_p9)  ;;  %v232_v8 = vld [vmem:[%s1221_s1 + $0x18] sm:$0xff] (!%p191_p9)  ;;  %p218_p10 = scmp.lt.s32.totalorder (!%p191_p9), %s1050_s22, 1  ;;  %vm315_vm0 = vcmask (!%p191_p9), 130048  }
   0xe   : > { %194 = sbr.rel (%p191_p9) target bundleno = 619 (0x26b), region = 40  ;;  %v229_v1 = vld [vmem:[%s1221_s1] sm:$0xff] (!%p191_p9)  ;;  %927 = vset.pattern.permute.xlu1 (!%p191_p9), %v992_v2  ;;  %926 = vset.pattern.permute.xlu0 (!%p191_p9), %v992_v2  ;;  %v230_v4 = vld [vmem:[%s1221_s1 + $0x8] sm:$0xff] (!%p191_p9)  ;;  %v231_v9 = vld [vmem:[%s1221_s1 + $0x10] sm:$0xff] (!%p191_p9)  ;;  %v993_v46 = vmov (!%p191_p9), 0.0|0.0   ;;  %vm994_vm1 = vmmov (!%p191_p9), 0  }
   0xf   : > { %279 = vperm.xlu1 (!%p191_p9), %927, %v271_v0   ;;  %237 = vperm.xlu0 (!%p191_p9), %926, %v229_v1   ;;  %v313_v5 = vld [vmem:[%s1223_s3] sm:$0xff] (!%p191_p9)  ;;  %v314_v6 = vld [vmem:[%s1223_s3 + $0x8] sm:$0xff] (!%p191_p9)  ;;  %v274_v10 = vld [vmem:[%s1222_s2 + $0x18] sm:$0xff] (!%p191_p9)  ;;  %v995_v47 = vmov (!%p191_p9), 0.0   ;;  %s215_s12 = sand.u32 (!%p191_p9), 1, %s982_s19   ;;  %vm681_vm2 = vcmask (!%p191_p9), 195584  }
  0x10   : > { %v865_v7 = vpack.c.bf16 (!%p191_p9), %v314_v6, %v313_v5  ;;  %v273_v11 = vld [vmem:[%s1222_s2 + $0x10] sm:$0xff] (!%p191_p9)  ;;  %v234_v12 = vld [vmem:[%s1221_s1 + $0x28] sm:$0xff] (!%p191_p9)  ;;  %v233_v13 = vld [vmem:[%s1221_s1 + $0x20] sm:$0xff] (!%p191_p9)  ;;  %869 = vmatprep.subr.bf16.mxu1 (!%p191_p9), %v993_v46  ;;  %830 = vmatprep.mubr.msk.f32.mxu1 (!%p191_p9), %vm994_vm1, %v995_v47  ;;  %s878_s13 = smul.u32 (!%p191_p9), 72, %s215_s12 }
  0x11   : > { %v276_v14 = vld [vmem:[%s1222_s2 + $0x28] sm:$0xff] (!%p191_p9)  ;;  %v275_v15 = vld [vmem:[%s1222_s2 + $0x20] sm:$0xff] (!%p191_p9)  ;;  %v431_v56 = vld [vmem:[%s1224_s4 + $0x10] sm:$0xff] (!%p191_p9)  ;;  %s880_s15 = smul.u32 (!%p191_p9), 1152, %s1050_s22 }
  0x12   : > { %866 = vmatprep.subr.bf16.mxu0 (!%p191_p9), %v865_v7  ;;  %v429_v51 = vld [vmem:[%s1224_s4] sm:$0xff] (!%p191_p9)  ;;  %v430_v54 = vld [vmem:[%s1224_s4 + $0x8] sm:$0xff] (!%p191_p9)  ;;  %s217_s14 = scalar_lea.vmem (!%p191_p9), [#allocation2], %s878_s13 }
  0x13   : > { %284 = vperm.xlu1 (!%p191_p9), %927, %v272_v3   ;;  %242 = vperm.xlu0 (!%p191_p9), %926, %v230_v4   ;;  %s705_s16 = sshll.u32 (!%p191_p9), %s217_s14, 4  ;;  %s1172_s25 = scalar_lea.hbm (!%p191_p9), %s1225_s5, %s880_s15  ;;  %s1174_s16 = int_to_ptr.vmem [resolvable:$true] %s705_s16 }
  0x14   : > { %868 = vmatpush3.bf16.msra.mxu0 (!%p191_p9), %v865_v7  ;;  %s928_s26 = scalar_lea.vmem (!%p191_p9), %s1174_s16, 1152 }
  0x15   : > { %s219_s17 = scalar_select %p218_p10, %s1050_s22, 1  ;;  %872 = vmatprep.subr.bf16.mxu0 %v993_v46 }
  0x16   : > { %s1179_s22 = scalar_lea.sflag [#allocation3], %s215_s12  ;;  %p929_p11 = scmp.ne.s32.totalorder %s1174_s16, %s928_s26 }
  0x17   : > { %252 = vperm.xlu1 %927, %v232_v8   ;;  %247 = vperm.xlu0 %926, %v231_v9   ;;  %s879_s23 = smul.u32 48, %s219_s17 }
  0x18   : > { %p930_p12 = pnand %p929_p11, %p1067_p5 }
  0x19   : > { %s222_s30 = scalar_lea.vmem %s1220_s0, %s879_s23 }
  0x1a   : > { %v223_v16 = vld [vmem:[%s222_s30] sm:$0xff]  ;;  %v224_v20 = vld [vmem:[%s222_s30 + $0x8] sm:$0xff]  ;;  %v226_v27 = vld [vmem:[%s222_s30 + $0x18] sm:$0xff]  ;;  %p931_p13 = pneg %p930_p12 }
  0x1b   : > { %294 = vperm.xlu1 %927, %v274_v10   ;;  %289 = vperm.xlu0 %926, %v273_v11   ;;  %v225_v29 = vld [vmem:[%s222_s30 + $0x10] sm:$0xff]  ;;  %v228_v37 = vld [vmem:[%s222_s30 + $0x28] sm:$0xff]  ;;  %v227_v39 = vld [vmem:[%s222_s30 + $0x20] sm:$0xff]  ;;  %s996_s30 = smov [#allocation2]  }
  0x1c   : > { %s932_s6 = sshll.u32 %s996_s30, 4  ;;  %s933_s6 = int_to_ptr.vmem [resolvable:$false] %s932_s6 }
  0x1d   : > { %s934_s7 = scalar_lea.vmem %s933_s6, 2304  ;;  %p935_p0 = scmp.lt.s32.totalorder %s1174_s16, %s933_s6 }
  0x1e   : > { %p936_p1 = scmp.lt.s32.totalorder %s934_s7, %s928_s26 }
  0x1f   : > { %262 = vperm.xlu1 %927, %v234_v12   ;;  %257 = vperm.xlu0 %926, %v233_v13  }
  0x20   : > { %p937_p2 = por %p936_p1, %p935_p0 }
  0x22   : > { %p938_p3 = pnand %p937_p2, %p931_p13 }
  0x23   : > { %304 = vperm.xlu1 %927, %v276_v14   ;;  %299 = vperm.xlu0 %926, %v275_v15  }
  0x8e   : > { %v280_v17 = vpop.permute.xlu1 %279  ;;  %v238_v18 = vpop.permute.xlu0 %237 }
  0x8f   : > { %v265_v19 = vsub.f32 %v223_v16, %v238_v18 }
  0x91   : > { %v307_v21 = vmul.f32 %v280_v17, %v265_v19 }
  0x92   : > { %v285_v22 = vpop.permute.xlu1 %284  ;;  %v243_v23 = vpop.permute.xlu0 %242 }
  0x93   : > { %v266_v24 = vsub.f32 %v224_v20, %v243_v23  ;;  %817 = vmatprep.mubr.msk.f32.mxu0 %vm315_vm0, %v307_v21 }
  0x95   : > { %v308_v25 = vmul.f32 %v285_v22, %v266_v24 }
  0x96   : > { %v253_v26 = vpop.permute.xlu1 %252  ;;  %v248_v28 = vpop.permute.xlu0 %247 }
  0x97   : > { %818 = vmatmul.mubr.msk.f32.vlgmr.msra.gmra.mrb[0].mxu0 %vm315_vm0, %v308_v25  ;;  %v268_v30 = vsub.f32 %v226_v27, %v253_v26  ;;  %v267_v31 = vsub.f32 %v225_v29, %v248_v28 }
  0x9a   : > { %v295_v32 = vpop.permute.xlu1 %294  ;;  %v290_v33 = vpop.permute.xlu0 %289 }
  0x9b   : > { %v310_v34 = vmul.f32 %v295_v32, %v268_v30  ;;  %v309_v35 = vmul.f32 %v290_v33, %v267_v31 }
  0x9d   : > { %820 = vmatprep.mubr.msk.f32.mxu0 %vm315_vm0, %v309_v35 }
  0x9e   : > { %v263_v36 = vpop.permute.xlu1 %262  ;;  %v258_v38 = vpop.permute.xlu0 %257  ;;  %821 = vmatmul.mubr.msk.f32.gmra.mrb[2].mxu0 %vm315_vm0, %v310_v34 }
  0x9f   : > { %v270_v40 = vsub.f32 %v228_v37, %v263_v36  ;;  %v269_v41 = vsub.f32 %v227_v39, %v258_v38 }
  0xa2   : > { %v305_v42 = vpop.permute.xlu1 %304  ;;  %v300_v43 = vpop.permute.xlu0 %299 }
  0xa3   : > { %v312_v44 = vmul.f32 %v305_v42, %v270_v40  ;;  %v311_v45 = vmul.f32 %v300_v43, %v269_v41 }
  0xa5   : > { %823 = vmatprep.mubr.msk.f32.mxu0 %vm315_vm0, %v311_v45 }
  0xa6   : > { %824 = vmatmul.mubr.msk.f32.gmra.mrb[4].mxu0 %vm315_vm0, %v312_v44 }
  0xa7   : > { %843 = vmatprep.mubr.msk.f32.mxu0 %vm994_vm1, %v995_v47 }
 0x16a   : > { %v819_v48 = vpop.f32.mrb[0].mxu0 }
 0x16b   : > { %v400_v49 = vpop.f32.mrb[1].mxu0 }
 0x16c   : > { %v870_v50 = vpack.c.bf16 %v819_v48, %v400_v49 }
 0x16e   : > { %871 = vmatpush3.bf16.msra.mxu1 %v870_v50 }
 0x16f   : > { %875 = vmatprep.subr.bf16.mxu1 %v993_v46 }
 0x171   : > { %v822_v52 = vpop.f32.mrb[2].mxu0  ;;  %831 = vmatmul.mubr.msk.f32.vlgmr.msra.gmra.mrb[0].mxu1 %vm315_vm0, %v429_v51 }
 0x172   : > { %v410_v53 = vpop.f32.mrb[3].mxu0  ;;  %833 = vmatprep.mubr.msk.f32.mxu1 %vm994_vm1, %v995_v47 }
 0x173   : > { %v873_v55 = vpack.c.bf16 %v822_v52, %v410_v53 }
 0x175   : > { %874 = vmatpush3.bf16.msra.mxu0 %v873_v55  ;;  %834 = vmatmul.mubr.msk.f32.gmra.mrb[2].mxu1 %vm315_vm0, %v430_v54 }
 0x176   : > { %836 = vmatprep.mubr.msk.f32.mxu1 %vm994_vm1, %v995_v47 }
 0x178   : > { %844 = vmatmul.mubr.msk.f32.vlgmr.msra.gmra.mrb[6].mxu0 %vm315_vm0, %v429_v51 }
 0x179   : > { %v825_v57 = vpop.f32.mrb[4].mxu0  ;;  %837 = vmatmul.mubr.msk.f32.gmra.mrb[4].mxu1 %vm315_vm0, %v431_v56  ;;  %846 = vmatprep.mubr.msk.f32.mxu0 %vm994_vm1, %v995_v47 }
 0x17a   : > { %v420_v58 = vpop.f32.mrb[5].mxu0  ;;  %856 = vmatprep.mubr.msk.f32.mxu1 %vm994_vm1, %v995_v47 }
 0x17b   : > { %v876_v59 = vpack.c.bf16 %v825_v57, %v420_v58 }
 0x17c   : > { %847 = vmatmul.mubr.msk.f32.gmra.mrb[8].mxu0 %vm315_vm0, %v430_v54 }
 0x17d   : > { %877 = vmatpush3.bf16.msra.mxu1 %v876_v59  ;;  %849 = vmatprep.mubr.msk.f32.mxu0 %vm994_vm1, %v995_v47 }
 0x180   : > { %857 = vmatmul.mubr.msk.f32.vlgmr.msra.gmra.mrb[6].mxu1 %vm315_vm0, %v429_v51  ;;  %850 = vmatmul.mubr.msk.f32.gmra.mrb[10].mxu0 %vm315_vm0, %v431_v56 }
 0x181   : > { %859 = vmatprep.mubr.msk.f32.mxu1 %vm994_vm1, %v995_v47 }
 0x184   : > { %860 = vmatmul.mubr.msk.f32.gmra.mrb[8].mxu1 %vm315_vm0, %v430_v54 }
 0x185   : > { %862 = vmatprep.mubr.msk.f32.mxu1 %vm994_vm1, %v995_v47 }
 0x188   : > { %863 = vmatmul.mubr.msk.f32.gmra.mrb[10].mxu1 %vm315_vm0, %v431_v56 }
 0x244   : > { %v507_v60 = vpop.f32.mrb[0].mxu1 }
 0x245   : > { %682 = vst.msk [vmem:[%s217_s14] sm:$0xff] %vm681_vm2, %v507_v60  ;;  %v832_v61 = vpop.f32.mrb[1].mxu1 }
 0x248   : > { %v512_v62 = vpop.f32.mrb[2].mxu1 }
 0x249   : > { %683 = vst.msk [vmem:[%s217_s14 + $0x8] sm:$0xff] %vm681_vm2, %v512_v62  ;;  %v835_v63 = vpop.f32.mrb[3].mxu1 }
 0x24b   : > { %v587_v0 = vpop.f32.mrb[6].mxu0 }
 0x24c   : > { %v517_v1 = vpop.f32.mrb[4].mxu1  ;;  %685 = vst.msk [vmem:[%s217_s14 + $0x18] sm:$0xff] %vm681_vm2, %v587_v0  ;;  %v845_v2 = vpop.f32.mrb[7].mxu0 }
 0x24d   : > { %684 = vst.msk [vmem:[%s217_s14 + $0x10] sm:$0xff] %vm681_vm2, %v517_v1  ;;  %v838_v3 = vpop.f32.mrb[5].mxu1 }
 0x24f   : > { %v592_v4 = vpop.f32.mrb[8].mxu0 }
 0x250   : > { %686 = vst.msk [vmem:[%s217_s14 + $0x20] sm:$0xff] %vm681_vm2, %v592_v4  ;;  %v848_v5 = vpop.f32.mrb[9].mxu0 }
 0x253   : > { %v667_v6 = vpop.f32.mrb[6].mxu1  ;;  %v597_v7 = vpop.f32.mrb[10].mxu0 }
 0x254   : > { %688 = vst.msk [vmem:[%s217_s14 + $0x30] sm:$0xff] %vm681_vm2, %v667_v6  ;;  %v858_v8 = vpop.f32.mrb[7].mxu1  ;;  %687 = vst.msk [vmem:[%s217_s14 + $0x28] sm:$0xff] %vm681_vm2, %v597_v7  ;;  %v851_v9 = vpop.f32.mrb[11].mxu0 }
 0x257   : > { %v672_v10 = vpop.f32.mrb[8].mxu1 }
 0x258   : > { %689 = vst.msk [vmem:[%s217_s14 + $0x38] sm:$0xff] %vm681_vm2, %v672_v10  ;;  %v861_v11 = vpop.f32.mrb[9].mxu1 }
 0x25b   : > { %v677_v12 = vpop.f32.mrb[10].mxu1 }
 0x25c   : > { %690 = vst.msk [vmem:[%s217_s14 + $0x40] sm:$0xff] %vm681_vm2, %v677_v12  ;;  %v864_v13 = vpop.f32.mrb[11].mxu1 }
 0x25d   : > { %941 = shalt.err (!%p938_p3)
}
 0x25e   : > { %s942_s8 = scalar_lea.hbm %s1172_s25, 1152  ;;  %s946_s11 = scalar_lea.hbm %s1225_s5, 2304 }
 0x25f   : > { %p943_p4 = scmp.ne.s32.totalorder %s1172_s25, %s942_s8  ;;  %p947_p9 = scmp.lt.u32.totalorder %s1172_s25, %s1225_s5 }
 0x260   : > { %p948_p10 = scmp.lt.u32.totalorder %s946_s11, %s942_s8  ;;  %p950_p12 = scmp.lt.u32.totalorder %s942_s8, %s1172_s25 }
 0x261   : > { %p944_p7 = pnand %p943_p4, %p1067_p5 }
 0x262   : > { %p949_p11 = por %p948_p10, %p947_p9 }
 0x263   : > { %p945_p8 = pneg %p944_p7 }
 0x264   : > { %p951_p13 = por %p950_p12, %p949_p11 }
 0x266   : > { %p952_p0 = pnand %p951_p13, %p945_p8 }
 0x268   : > { %955 = shalt.err (!%p952_p0)
}
 0x269   : > { %s997_s14 = smov 128   ;;  %s998_s15 = smov 8  }
 0x26a   : > { %881 = dma.vmem_to_hbm [thread:$0]  (%p1067_p5), %s1174_s16, 1152, %s1172_s25, %s1179_s22, %s997_s14, %s997_s14, %s998_s15  }
 0x26b PF: > { %p887_p1 = scmp.ge.s32.totalorder %s990_s21, 2  ;;  %s720_s17 = sand.u32 1, %s978_s18  }
 0x26c   : > { %s721_s23 = scalar_lea.sflag [#allocation3], %s720_s17 }
 0x26d   : > { %p884_p2 = pnand %p887_p1, %p1071_p6 }
 0x26f   : > { %973 = dma.done.wait (!%p884_p2), %s721_s23, 1152  }
 0x270   : > { %975 = vsyncadd (!%p884_p2), %s721_s23, 4294966144  ;;  %p15_p3 = scmp.ge.s32.totalorder %s1054_s24, 4   ;;  %s1228_s18 = smov %s982_s19 }
 0x271   : > { %s1229_s19 = smov %s986_s20  ;;  %s1230_s20 = smov %s1065_s27 }
 0x272   : > { %s1231_s21 = smov %s1054_s24  ;;  %17 = sbr.rel (!%p15_p3) target bundleno = 3 (0x3), region = 75 }
 0x279   :  { %726 = vsyncpa [#allocation3], 1 }
 0x27a   :  { %728 = vsyncpa [#allocation3 + $0x1], 1 }

</bundles_post_ra>
